<compile_context>
chip_gen: v7x
topology: tpu7x:2x2x1
jax: 0.10.0
libtpu: 0.0.40
codegen_flags: <defaults>
</compile_context>

<pallas_src>
from functools import partial

import jax
import jax.numpy as jnp
from jax import lax
from jax.experimental import pallas as pl
from jax.experimental.pallas import tpu as pltpu

_LANES = 128


def _round_up(n, m):
    return ((n + m - 1) // m) * m


def gru_fc_kernel(x_ref,        # (T*Bp, I)  time-major, batch padded to Bp
                  w_gru_ref,    # (I+H, 3H)  rows [0:I]=W_ih^T, [I:I+H]=W_hh^T
                  b_gru_ref,    # (2, 3H)    row0 = input bias, row1[2H:] = b_hn
                  w_fc_ref,     # (H+1, C)   rows [0:H]=W_fc^T, row H = b_fc
                  out_ref,      # (Bp, 128)  [:, :H]=h_T, [:, H:H+C]=logits
                  *, batch_p, seq_len, input_size, hidden, num_classes):
    Bp, T, I, H, C = batch_p, seq_len, input_size, hidden, num_classes

    x2 = x_ref[...]                              # (T*Bp, I)
    w_ih = w_gru_ref[0:I, :]                     # (I, 3H)
    w_hh = w_gru_ref[I:I + H, :]                 # (H, 3H)
    b_gi = b_gru_ref[0:1, :]                     # (1, 3H)

    # --- hoisted input projection: ONE MXU pass for all gates & timesteps ---
    gi = jnp.dot(x2, w_ih, preferred_element_type=jnp.float32) + b_gi  # (T*Bp, 3H)

    # Split gates once, off the serial chain (per-step slices below are
    # sublane-aligned because Bp is a multiple of 8).
    gi_r = gi[:, 0:H]
    gi_z = gi[:, H:2 * H]
    gi_n = gi[:, 2 * H:3 * H]

    # Hidden-side n bias stays inside r * (...) per PyTorch GRU semantics;
    # hoist its broadcast out of the loop (JAX does not CSE broadcasts).
    b_hn = jnp.broadcast_to(b_gru_ref[1:2, 2 * H:3 * H], (Bp, H))

    # --- serial recurrence, fully unrolled (T is small & static) ---
    h = jnp.zeros((Bp, H), dtype=jnp.float32)
    for t in range(T):
        lo = t * Bp                              # multiple of 8 -> aligned
        # ONE fused hidden matmul per step (3H = 96 <= 128 output lanes).
        gh = jnp.dot(h, w_hh, preferred_element_type=jnp.float32)     # (Bp, 3H)
        r = jax.nn.sigmoid(gi_r[lo:lo + Bp, :] + gh[:, 0:H])
        z = jax.nn.sigmoid(gi_z[lo:lo + Bp, :] + gh[:, H:2 * H])
        n = jnp.tanh(gi_n[lo:lo + Bp, :] + r * (gh[:, 2 * H:3 * H] + b_hn))
        h = (1.0 - z) * n + z * h

    # Dropout on out[:, -1, :] is identity in eval mode; out[:, -1, :] == h.
    logits = (jnp.dot(h, w_fc_ref[0:H, :], preferred_element_type=jnp.float32)
              + w_fc_ref[H:H + 1, :])

    # Single lane-dense 128-wide store: [ h | logits | zero pad ].
    pad = jnp.zeros((Bp, _LANES - H - C), dtype=jnp.float32)
    out_ref[...] = jnp.concatenate([h, logits, pad], axis=-1)


def pack_gru_params(params):
    """One-time packing of the PyTorch-style GRU/FC params into kernel slabs."""
    w_ih = params["w_ih"].astype(jnp.float32)    # (3H, I), gate order [r, z, n]
    w_hh = params["w_hh"].astype(jnp.float32)    # (3H, H)
    b_ih = params["b_ih"].astype(jnp.float32)    # (3H,)
    b_hh = params["b_hh"].astype(jnp.float32)    # (3H,)
    H = w_hh.shape[1]
    I = w_ih.shape[1]
    C = params["w_fc"].shape[0]

    # (I+H, 3H): transposes put gates [r|z|n] along lanes automatically.
    w_gru = jnp.concatenate([w_ih.T, w_hh.T], axis=0)

    # Row 0: input-side bias (r/z combined with hidden bias, n input-only).
    b_gi = jnp.concatenate([b_ih[0:H] + b_hh[0:H],
                            b_ih[H:2 * H] + b_hh[H:2 * H],
                            b_ih[2 * H:3 * H]])
    # Row 1: hidden-side n bias in the n-gate lane slot.
    b_hn_row = jnp.concatenate([jnp.zeros((2 * H,), jnp.float32),
                                b_hh[2 * H:3 * H]])
    b_gru = jnp.stack([b_gi, b_hn_row])          # (2, 3H)

    w_fc = jnp.concatenate([params["w_fc"].T.astype(jnp.float32),
                            params["b_fc"].reshape(1, C).astype(jnp.float32)],
                           axis=0)               # (H+1, C)

    return {"w_gru": w_gru, "b_gru": b_gru, "w_fc": w_fc,
            "input_size": I, "hidden": H, "num_classes": C}


def gru_model_apply(x, packed):
    """Run the Pallas forward with pre-packed params. Returns (fc_out, h_n)."""
    B, T, I = x.shape
    H = packed["hidden"]
    C = packed["num_classes"]
    assert I == packed["input_size"]
    assert H + C <= _LANES, "packed output slab assumes H + C <= 128 lanes"

    Bp = _round_up(max(B, 8), 8)                 # sublane-align the batch

    # Time-major, batch-padded, flattened: row t*Bp + b holds x[b, t, :].
    x_tm = jnp.transpose(x, (1, 0, 2)).astype(jnp.float32)       # (T, B, I)
    if Bp != B:
        x_tm = jnp.pad(x_tm, ((0, 0), (0, Bp - B), (0, 0)))
    x_tb = x_tm.reshape(T * Bp, I)

    vmem = pl.BlockSpec(memory_space=pltpu.MemorySpace.VMEM)

    out = pl.pallas_call(
        partial(gru_fc_kernel, batch_p=Bp, seq_len=T, input_size=I,
                hidden=H, num_classes=C),
        out_shape=jax.ShapeDtypeStruct((Bp, _LANES), jnp.float32),
        in_specs=[vmem] * 4,
        out_specs=vmem,
    )(x_tb, packed["w_gru"], packed["b_gru"], packed["w_fc"])

    h_last = out[:B, 0:H]                        # h_T  (== out[:, -1, :])
    logits = out[:B, H:H + C]                    # fc(dropout(out[:, -1, :]))
    h_n = h_last[None, :, :]                     # (1, B, H) like PyTorch h_n
    return logits, h_n


def my_gru_model_forward(x, params):
    """Convenience wrapper; prefer caching pack_gru_params() across calls."""
    return gru_model_apply(x, pack_gru_params(params))


def reference_forward(x, params):
    """Pure-JAX reference of the same forward pass (for verification)."""
    B, T, I = x.shape
    H = params["w_hh"].shape[1]
    wih_t, whh_t = params["w_ih"].T, params["w_hh"].T
    bih, bhh = params["b_ih"], params["b_hh"]

    def step(h, x_t):
        gi = x_t @ wih_t + bih
        gh = h @ whh_t + bhh
        i_r, i_z, i_n = gi[:, :H], gi[:, H:2 * H], gi[:, 2 * H:]
        h_r, h_z, h_n = gh[:, :H], gh[:, H:2 * H], gh[:, 2 * H:]
        r = jax.nn.sigmoid(i_r + h_r)
        z = jax.nn.sigmoid(i_z + h_z)
        n = jnp.tanh(i_n + r * h_n)
        h_new = (1.0 - z) * n + z * h
        return h_new, None

    h0 = jnp.zeros((B, H), dtype=jnp.float32)
    h_last, _ = lax.scan(step, h0, jnp.swapaxes(x, 0, 1))
    logits = h_last @ params["w_fc"].T + params["b_fc"]
    return logits, h_last[None]


if __name__ == "__main__":
    # Small shapes implied by the module: batch=2, seq=8, input=8, hidden=32, classes=4
    B, T, I, H, C = 2, 8, 8, 32, 4

    key = jax.random.PRNGKey(0)
    ks = jax.random.split(key, 7)
    params = {
        "w_ih": 0.1 * jax.random.normal(ks[0], (3 * H, I), jnp.float32),
        "w_hh": 0.1 * jax.random.normal(ks[1], (3 * H, H), jnp.float32),
        "b_ih": 0.1 * jax.random.normal(ks[2], (3 * H,), jnp.float32),
        "b_hh": 0.1 * jax.random.normal(ks[3], (3 * H,), jnp.float32),
        "w_fc": 0.1 * jax.random.normal(ks[4], (C, H), jnp.float32),
        "b_fc": 0.1 * jax.random.normal(ks[5], (C,), jnp.float32),
    }
    x = jax.random.normal(ks[6], (B, T, I), jnp.float32)

    packed = pack_gru_params(params)             # one-time packing (cacheable)
    logits, h_n = gru_model_apply(x, packed)
    jax.block_until_ready((logits, h_n))

    ref_logits, ref_h_n = reference_forward(x, params)
    assert jnp.allclose(logits, ref_logits, atol=1e-4, rtol=1e-4)
    assert jnp.allclose(h_n, ref_h_n, atol=1e-4, rtol=1e-4)

    print("KERNEL_OK")
</pallas_src>

<mosaic_0001>
module attributes {stable_mosaic.version = 11 : i64} {
  func.func @gru_fc_kernel(%arg0: memref<64x8xf32, #tpu.memory_space<vmem>>, %arg1: memref<40x96xf32, #tpu.memory_space<vmem>>, %arg2: memref<2x96xf32, #tpu.memory_space<vmem>>, %arg3: memref<33x4xf32, #tpu.memory_space<vmem>>, %arg4: memref<8x128xf32, #tpu.memory_space<vmem>>) attributes {dimension_semantics = [], scalar_prefetch = 0 : i64, scratch_operands = 0 : i64, tpu.core_type = #tpu.core_type<tc>} {
    %c0 = arith.constant 0 : index
    %c0_0 = arith.constant 0 : index
    %0 = vector.load %arg0[%c0, %c0_0] : memref<64x8xf32, #tpu.memory_space<vmem>>, vector<64x8xf32>
    %c0_1 = arith.constant 0 : index
    %c0_2 = arith.constant 0 : index
    %1 = vector.load %arg1[%c0_1, %c0_2] : memref<40x96xf32, #tpu.memory_space<vmem>>, vector<8x96xf32>
    %c8 = arith.constant 8 : index
    %c0_3 = arith.constant 0 : index
    %2 = vector.load %arg1[%c8, %c0_3] : memref<40x96xf32, #tpu.memory_space<vmem>>, vector<32x96xf32>
    %c0_4 = arith.constant 0 : index
    %c0_5 = arith.constant 0 : index
    %3 = vector.load %arg2[%c0_4, %c0_5] : memref<2x96xf32, #tpu.memory_space<vmem>>, vector<1x96xf32>
    %cst = arith.constant dense<0.000000e+00> : vector<64x96xf32>
    %4 = tpu.matmul %0, %1, %cst {dimension_numbers = #tpu.dot_dimension_numbers<[1], [0], [0], [1], [0, 0, 1, 1], [], []>} : vector<64x8xf32>, vector<8x96xf32>, vector<64x96xf32> -> vector<64x96xf32>
    %5 = vector.broadcast %3 : vector<1x96xf32> to vector<64x96xf32>
    %6 = arith.addf %4, %5 : vector<64x96xf32>
    %7 = vector.extract_strided_slice %6 {offsets = [0, 0], sizes = [64, 32], strides = [1, 1]} : vector<64x96xf32> to vector<64x32xf32>
    %8 = vector.extract_strided_slice %6 {offsets = [0, 32], sizes = [64, 32], strides = [1, 1]} : vector<64x96xf32> to vector<64x32xf32>
    %9 = vector.extract_strided_slice %6 {offsets = [0, 64], sizes = [64, 32], strides = [1, 1]} : vector<64x96xf32> to vector<64x32xf32>
    %c1 = arith.constant 1 : index
    %c64 = arith.constant 64 : index
    %10 = vector.load %arg2[%c1, %c64] : memref<2x96xf32, #tpu.memory_space<vmem>>, vector<1x32xf32>
    %11 = vector.shape_cast %10 : vector<1x32xf32> to vector<1x32xf32>
    %12 = vector.broadcast %11 : vector<1x32xf32> to vector<8x32xf32>
    %cst_6 = arith.constant 0.000000e+00 : f32
    %13 = vector.broadcast %cst_6 : f32 to vector<8x32xf32>
    %cst_7 = arith.constant dense<0.000000e+00> : vector<8x96xf32>
    %14 = tpu.matmul %13, %2, %cst_7 {dimension_numbers = #tpu.dot_dimension_numbers<[1], [0], [0], [1], [0, 0, 1, 1], [], []>} : vector<8x32xf32>, vector<32x96xf32>, vector<8x96xf32> -> vector<8x96xf32>
    %15 = vector.extract_strided_slice %7 {offsets = [0, 0], sizes = [8, 32], strides = [1, 1]} : vector<64x32xf32> to vector<8x32xf32>
    %16 = vector.extract_strided_slice %14 {offsets = [0, 0], sizes = [8, 32], strides = [1, 1]} : vector<8x96xf32> to vector<8x32xf32>
    %17 = arith.addf %15, %16 : vector<8x32xf32>
    %18 = arith.negf %17 : vector<8x32xf32>
    %19 = math.exp %18 : vector<8x32xf32>
    %cst_8 = arith.constant 1.000000e+00 : f32
    %20 = vector.broadcast %cst_8 : f32 to vector<8x32xf32>
    %21 = arith.addf %20, %19 : vector<8x32xf32>
    %22 = arith.divf %20, %21 : vector<8x32xf32>
    %23 = vector.extract_strided_slice %8 {offsets = [0, 0], sizes = [8, 32], strides = [1, 1]} : vector<64x32xf32> to vector<8x32xf32>
    %24 = vector.extract_strided_slice %14 {offsets = [0, 32], sizes = [8, 32], strides = [1, 1]} : vector<8x96xf32> to vector<8x32xf32>
    %25 = arith.addf %23, %24 : vector<8x32xf32>
    %26 = arith.negf %25 : vector<8x32xf32>
    %27 = math.exp %26 : vector<8x32xf32>
    %cst_9 = arith.constant 1.000000e+00 : f32
    %28 = vector.broadcast %cst_9 : f32 to vector<8x32xf32>
    %29 = arith.addf %28, %27 : vector<8x32xf32>
    %30 = arith.divf %28, %29 : vector<8x32xf32>
    %31 = vector.extract_strided_slice %9 {offsets = [0, 0], sizes = [8, 32], strides = [1, 1]} : vector<64x32xf32> to vector<8x32xf32>
    %32 = vector.extract_strided_slice %14 {offsets = [0, 64], sizes = [8, 32], strides = [1, 1]} : vector<8x96xf32> to vector<8x32xf32>
    %33 = arith.addf %32, %12 : vector<8x32xf32>
    %34 = arith.mulf %22, %33 : vector<8x32xf32>
    %35 = arith.addf %31, %34 : vector<8x32xf32>
    %36 = math.tanh %35 : vector<8x32xf32>
    %cst_10 = arith.constant 1.000000e+00 : f32
    %37 = vector.broadcast %cst_10 : f32 to vector<8x32xf32>
    %38 = arith.subf %37, %30 : vector<8x32xf32>
    %39 = arith.mulf %38, %36 : vector<8x32xf32>
    %40 = arith.mulf %30, %13 : vector<8x32xf32>
    %41 = arith.addf %39, %40 : vector<8x32xf32>
    %cst_11 = arith.constant dense<0.000000e+00> : vector<8x96xf32>
    %42 = tpu.matmul %41, %2, %cst_11 {dimension_numbers = #tpu.dot_dimension_numbers<[1], [0], [0], [1], [0, 0, 1, 1], [], []>} : vector<8x32xf32>, vector<32x96xf32>, vector<8x96xf32> -> vector<8x96xf32>
    %43 = vector.extract_strided_slice %7 {offsets = [8, 0], sizes = [8, 32], strides = [1, 1]} : vector<64x32xf32> to vector<8x32xf32>
    %44 = vector.extract_strided_slice %42 {offsets = [0, 0], sizes = [8, 32], strides = [1, 1]} : vector<8x96xf32> to vector<8x32xf32>
    %45 = arith.addf %43, %44 : vector<8x32xf32>
    %46 = arith.negf %45 : vector<8x32xf32>
    %47 = math.exp %46 : vector<8x32xf32>
    %cst_12 = arith.constant 1.000000e+00 : f32
    %48 = vector.broadcast %cst_12 : f32 to vector<8x32xf32>
    %49 = arith.addf %48, %47 : vector<8x32xf32>
    %50 = arith.divf %48, %49 : vector<8x32xf32>
    %51 = vector.extract_strided_slice %8 {offsets = [8, 0], sizes = [8, 32], strides = [1, 1]} : vector<64x32xf32> to vector<8x32xf32>
    %52 = vector.extract_strided_slice %42 {offsets = [0, 32], sizes = [8, 32], strides = [1, 1]} : vector<8x96xf32> to vector<8x32xf32>
    %53 = arith.addf %51, %52 : vector<8x32xf32>
    %54 = arith.negf %53 : vector<8x32xf32>
    %55 = math.exp %54 : vector<8x32xf32>
    %cst_13 = arith.constant 1.000000e+00 : f32
    %56 = vector.broadcast %cst_13 : f32 to vector<8x32xf32>
    %57 = arith.addf %56, %55 : vector<8x32xf32>
    %58 = arith.divf %56, %57 : vector<8x32xf32>
    %59 = vector.extract_strided_slice %9 {offsets = [8, 0], sizes = [8, 32], strides = [1, 1]} : vector<64x32xf32> to vector<8x32xf32>
    %60 = vector.extract_strided_slice %42 {offsets = [0, 64], sizes = [8, 32], strides = [1, 1]} : vector<8x96xf32> to vector<8x32xf32>
    %61 = arith.addf %60, %12 : vector<8x32xf32>
    %62 = arith.mulf %50, %61 : vector<8x32xf32>
    %63 = arith.addf %59, %62 : vector<8x32xf32>
    %64 = math.tanh %63 : vector<8x32xf32>
    %cst_14 = arith.constant 1.000000e+00 : f32
    %65 = vector.broadcast %cst_14 : f32 to vector<8x32xf32>
    %66 = arith.subf %65, %58 : vector<8x32xf32>
    %67 = arith.mulf %66, %64 : vector<8x32xf32>
    %68 = arith.mulf %58, %41 : vector<8x32xf32>
    %69 = arith.addf %67, %68 : vector<8x32xf32>
    %cst_15 = arith.constant dense<0.000000e+00> : vector<8x96xf32>
    %70 = tpu.matmul %69, %2, %cst_15 {dimension_numbers = #tpu.dot_dimension_numbers<[1], [0], [0], [1], [0, 0, 1, 1], [], []>} : vector<8x32xf32>, vector<32x96xf32>, vector<8x96xf32> -> vector<8x96xf32>
    %71 = vector.extract_strided_slice %7 {offsets = [16, 0], sizes = [8, 32], strides = [1, 1]} : vector<64x32xf32> to vector<8x32xf32>
    %72 = vector.extract_strided_slice %70 {offsets = [0, 0], sizes = [8, 32], strides = [1, 1]} : vector<8x96xf32> to vector<8x32xf32>
    %73 = arith.addf %71, %72 : vector<8x32xf32>
    %74 = arith.negf %73 : vector<8x32xf32>
    %75 = math.exp %74 : vector<8x32xf32>
    %cst_16 = arith.constant 1.000000e+00 : f32
    %76 = vector.broadcast %cst_16 : f32 to vector<8x32xf32>
    %77 = arith.addf %76, %75 : vector<8x32xf32>
    %78 = arith.divf %76, %77 : vector<8x32xf32>
    %79 = vector.extract_strided_slice %8 {offsets = [16, 0], sizes = [8, 32], strides = [1, 1]} : vector<64x32xf32> to vector<8x32xf32>
    %80 = vector.extract_strided_slice %70 {offsets = [0, 32], sizes = [8, 32], strides = [1, 1]} : vector<8x96xf32> to vector<8x32xf32>
    %81 = arith.addf %79, %80 : vector<8x32xf32>
    %82 = arith.negf %81 : vector<8x32xf32>
    %83 = math.exp %82 : vector<8x32xf32>
    %cst_17 = arith.constant 1.000000e+00 : f32
    %84 = vector.broadcast %cst_17 : f32 to vector<8x32xf32>
    %85 = arith.addf %84, %83 : vector<8x32xf32>
    %86 = arith.divf %84, %85 : vector<8x32xf32>
    %87 = vector.extract_strided_slice %9 {offsets = [16, 0], sizes = [8, 32], strides = [1, 1]} : vector<64x32xf32> to vector<8x32xf32>
    %88 = vector.extract_strided_slice %70 {offsets = [0, 64], sizes = [8, 32], strides = [1, 1]} : vector<8x96xf32> to vector<8x32xf32>
    %89 = arith.addf %88, %12 : vector<8x32xf32>
    %90 = arith.mulf %78, %89 : vector<8x32xf32>
    %91 = arith.addf %87, %90 : vector<8x32xf32>
    %92 = math.tanh %91 : vector<8x32xf32>
    %cst_18 = arith.constant 1.000000e+00 : f32
    %93 = vector.broadcast %cst_18 : f32 to vector<8x32xf32>
    %94 = arith.subf %93, %86 : vector<8x32xf32>
    %95 = arith.mulf %94, %92 : vector<8x32xf32>
    %96 = arith.mulf %86, %69 : vector<8x32xf32>
    %97 = arith.addf %95, %96 : vector<8x32xf32>
    %cst_19 = arith.constant dense<0.000000e+00> : vector<8x96xf32>
    %98 = tpu.matmul %97, %2, %cst_19 {dimension_numbers = #tpu.dot_dimension_numbers<[1], [0], [0], [1], [0, 0, 1, 1], [], []>} : vector<8x32xf32>, vector<32x96xf32>, vector<8x96xf32> -> vector<8x96xf32>
    %99 = vector.extract_strided_slice %7 {offsets = [24, 0], sizes = [8, 32], strides = [1, 1]} : vector<64x32xf32> to vector<8x32xf32>
    %100 = vector.extract_strided_slice %98 {offsets = [0, 0], sizes = [8, 32], strides = [1, 1]} : vector<8x96xf32> to vector<8x32xf32>
    %101 = arith.addf %99, %100 : vector<8x32xf32>
    %102 = arith.negf %101 : vector<8x32xf32>
    %103 = math.exp %102 : vector<8x32xf32>
    %cst_20 = arith.constant 1.000000e+00 : f32
    %104 = vector.broadcast %cst_20 : f32 to vector<8x32xf32>
    %105 = arith.addf %104, %103 : vector<8x32xf32>
    %106 = arith.divf %104, %105 : vector<8x32xf32>
    %107 = vector.extract_strided_slice %8 {offsets = [24, 0], sizes = [8, 32], strides = [1, 1]} : vector<64x32xf32> to vector<8x32xf32>
    %108 = vector.extract_strided_slice %98 {offsets = [0, 32], sizes = [8, 32], strides = [1, 1]} : vector<8x96xf32> to vector<8x32xf32>
    %109 = arith.addf %107, %108 : vector<8x32xf32>
    %110 = arith.negf %109 : vector<8x32xf32>
    %111 = math.exp %110 : vector<8x32xf32>
    %cst_21 = arith.constant 1.000000e+00 : f32
    %112 = vector.broadcast %cst_21 : f32 to vector<8x32xf32>
    %113 = arith.addf %112, %111 : vector<8x32xf32>
    %114 = arith.divf %112, %113 : vector<8x32xf32>
    %115 = vector.extract_strided_slice %9 {offsets = [24, 0], sizes = [8, 32], strides = [1, 1]} : vector<64x32xf32> to vector<8x32xf32>
    %116 = vector.extract_strided_slice %98 {offsets = [0, 64], sizes = [8, 32], strides = [1, 1]} : vector<8x96xf32> to vector<8x32xf32>
    %117 = arith.addf %116, %12 : vector<8x32xf32>
    %118 = arith.mulf %106, %117 : vector<8x32xf32>
    %119 = arith.addf %115, %118 : vector<8x32xf32>
    %120 = math.tanh %119 : vector<8x32xf32>
    %cst_22 = arith.constant 1.000000e+00 : f32
    %121 = vector.broadcast %cst_22 : f32 to vector<8x32xf32>
    %122 = arith.subf %121, %114 : vector<8x32xf32>
    %123 = arith.mulf %122, %120 : vector<8x32xf32>
    %124 = arith.mulf %114, %97 : vector<8x32xf32>
    %125 = arith.addf %123, %124 : vector<8x32xf32>
    %cst_23 = arith.constant dense<0.000000e+00> : vector<8x96xf32>
    %126 = tpu.matmul %125, %2, %cst_23 {dimension_numbers = #tpu.dot_dimension_numbers<[1], [0], [0], [1], [0, 0, 1, 1], [], []>} : vector<8x32xf32>, vector<32x96xf32>, vector<8x96xf32> -> vector<8x96xf32>
    %127 = vector.extract_strided_slice %7 {offsets = [32, 0], sizes = [8, 32], strides = [1, 1]} : vector<64x32xf32> to vector<8x32xf32>
    %128 = vector.extract_strided_slice %126 {offsets = [0, 0], sizes = [8, 32], strides = [1, 1]} : vector<8x96xf32> to vector<8x32xf32>
    %129 = arith.addf %127, %128 : vector<8x32xf32>
    %130 = arith.negf %129 : vector<8x32xf32>
    %131 = math.exp %130 : vector<8x32xf32>
    %cst_24 = arith.constant 1.000000e+00 : f32
    %132 = vector.broadcast %cst_24 : f32 to vector<8x32xf32>
    %133 = arith.addf %132, %131 : vector<8x32xf32>
    %134 = arith.divf %132, %133 : vector<8x32xf32>
    %135 = vector.extract_strided_slice %8 {offsets = [32, 0], sizes = [8, 32], strides = [1, 1]} : vector<64x32xf32> to vector<8x32xf32>
    %136 = vector.extract_strided_slice %126 {offsets = [0, 32], sizes = [8, 32], strides = [1, 1]} : vector<8x96xf32> to vector<8x32xf32>
    %137 = arith.addf %135, %136 : vector<8x32xf32>
    %138 = arith.negf %137 : vector<8x32xf32>
    %139 = math.exp %138 : vector<8x32xf32>
    %cst_25 = arith.constant 1.000000e+00 : f32
    %140 = vector.broadcast %cst_25 : f32 to vector<8x32xf32>
    %141 = arith.addf %140, %139 : vector<8x32xf32>
    %142 = arith.divf %140, %141 : vector<8x32xf32>
    %143 = vector.extract_strided_slice %9 {offsets = [32, 0], sizes = [8, 32], strides = [1, 1]} : vector<64x32xf32> to vector<8x32xf32>
    %144 = vector.extract_strided_slice %126 {offsets = [0, 64], sizes = [8, 32], strides = [1, 1]} : vector<8x96xf32> to vector<8x32xf32>
    %145 = arith.addf %144, %12 : vector<8x32xf32>
    %146 = arith.mulf %134, %145 : vector<8x32xf32>
    %147 = arith.addf %143, %146 : vector<8x32xf32>
    %148 = math.tanh %147 : vector<8x32xf32>
    %cst_26 = arith.constant 1.000000e+00 : f32
    %149 = vector.broadcast %cst_26 : f32 to vector<8x32xf32>
    %150 = arith.subf %149, %142 : vector<8x32xf32>
    %151 = arith.mulf %150, %148 : vector<8x32xf32>
    %152 = arith.mulf %142, %125 : vector<8x32xf32>
    %153 = arith.addf %151, %152 : vector<8x32xf32>
    %cst_27 = arith.constant dense<0.000000e+00> : vector<8x96xf32>
    %154 = tpu.matmul %153, %2, %cst_27 {dimension_numbers = #tpu.dot_dimension_numbers<[1], [0], [0], [1], [0, 0, 1, 1], [], []>} : vector<8x32xf32>, vector<32x96xf32>, vector<8x96xf32> -> vector<8x96xf32>
    %155 = vector.extract_strided_slice %7 {offsets = [40, 0], sizes = [8, 32], strides = [1, 1]} : vector<64x32xf32> to vector<8x32xf32>
    %156 = vector.extract_strided_slice %154 {offsets = [0, 0], sizes = [8, 32], strides = [1, 1]} : vector<8x96xf32> to vector<8x32xf32>
    %157 = arith.addf %155, %156 : vector<8x32xf32>
    %158 = arith.negf %157 : vector<8x32xf32>
    %159 = math.exp %158 : vector<8x32xf32>
    %cst_28 = arith.constant 1.000000e+00 : f32
    %160 = vector.broadcast %cst_28 : f32 to vector<8x32xf32>
    %161 = arith.addf %160, %159 : vector<8x32xf32>
    %162 = arith.divf %160, %161 : vector<8x32xf32>
    %163 = vector.extract_strided_slice %8 {offsets = [40, 0], sizes = [8, 32], strides = [1, 1]} : vector<64x32xf32> to vector<8x32xf32>
    %164 = vector.extract_strided_slice %154 {offsets = [0, 32], sizes = [8, 32], strides = [1, 1]} : vector<8x96xf32> to vector<8x32xf32>
    %165 = arith.addf %163, %164 : vector<8x32xf32>
    %166 = arith.negf %165 : vector<8x32xf32>
    %167 = math.exp %166 : vector<8x32xf32>
    %cst_29 = arith.constant 1.000000e+00 : f32
    %168 = vector.broadcast %cst_29 : f32 to vector<8x32xf32>
    %169 = arith.addf %168, %167 : vector<8x32xf32>
    %170 = arith.divf %168, %169 : vector<8x32xf32>
    %171 = vector.extract_strided_slice %9 {offsets = [40, 0], sizes = [8, 32], strides = [1, 1]} : vector<64x32xf32> to vector<8x32xf32>
    %172 = vector.extract_strided_slice %154 {offsets = [0, 64], sizes = [8, 32], strides = [1, 1]} : vector<8x96xf32> to vector<8x32xf32>
    %173 = arith.addf %172, %12 : vector<8x32xf32>
    %174 = arith.mulf %162, %173 : vector<8x32xf32>
    %175 = arith.addf %171, %174 : vector<8x32xf32>
    %176 = math.tanh %175 : vector<8x32xf32>
    %cst_30 = arith.constant 1.000000e+00 : f32
    %177 = vector.broadcast %cst_30 : f32 to vector<8x32xf32>
    %178 = arith.subf %177, %170 : vector<8x32xf32>
    %179 = arith.mulf %178, %176 : vector<8x32xf32>
    %180 = arith.mulf %170, %153 : vector<8x32xf32>
    %181 = arith.addf %179, %180 : vector<8x32xf32>
    %cst_31 = arith.constant dense<0.000000e+00> : vector<8x96xf32>
    %182 = tpu.matmul %181, %2, %cst_31 {dimension_numbers = #tpu.dot_dimension_numbers<[1], [0], [0], [1], [0, 0, 1, 1], [], []>} : vector<8x32xf32>, vector<32x96xf32>, vector<8x96xf32> -> vector<8x96xf32>
    %183 = vector.extract_strided_slice %7 {offsets = [48, 0], sizes = [8, 32], strides = [1, 1]} : vector<64x32xf32> to vector<8x32xf32>
    %184 = vector.extract_strided_slice %182 {offsets = [0, 0], sizes = [8, 32], strides = [1, 1]} : vector<8x96xf32> to vector<8x32xf32>
    %185 = arith.addf %183, %184 : vector<8x32xf32>
    %186 = arith.negf %185 : vector<8x32xf32>
    %187 = math.exp %186 : vector<8x32xf32>
    %cst_32 = arith.constant 1.000000e+00 : f32
    %188 = vector.broadcast %cst_32 : f32 to vector<8x32xf32>
    %189 = arith.addf %188, %187 : vector<8x32xf32>
    %190 = arith.divf %188, %189 : vector<8x32xf32>
    %191 = vector.extract_strided_slice %8 {offsets = [48, 0], sizes = [8, 32], strides = [1, 1]} : vector<64x32xf32> to vector<8x32xf32>
    %192 = vector.extract_strided_slice %182 {offsets = [0, 32], sizes = [8, 32], strides = [1, 1]} : vector<8x96xf32> to vector<8x32xf32>
    %193 = arith.addf %191, %192 : vector<8x32xf32>
    %194 = arith.negf %193 : vector<8x32xf32>
    %195 = math.exp %194 : vector<8x32xf32>
    %cst_33 = arith.constant 1.000000e+00 : f32
    %196 = vector.broadcast %cst_33 : f32 to vector<8x32xf32>
    %197 = arith.addf %196, %195 : vector<8x32xf32>
    %198 = arith.divf %196, %197 : vector<8x32xf32>
    %199 = vector.extract_strided_slice %9 {offsets = [48, 0], sizes = [8, 32], strides = [1, 1]} : vector<64x32xf32> to vector<8x32xf32>
    %200 = vector.extract_strided_slice %182 {offsets = [0, 64], sizes = [8, 32], strides = [1, 1]} : vector<8x96xf32> to vector<8x32xf32>
    %201 = arith.addf %200, %12 : vector<8x32xf32>
    %202 = arith.mulf %190, %201 : vector<8x32xf32>
    %203 = arith.addf %199, %202 : vector<8x32xf32>
    %204 = math.tanh %203 : vector<8x32xf32>
    %cst_34 = arith.constant 1.000000e+00 : f32
    %205 = vector.broadcast %cst_34 : f32 to vector<8x32xf32>
    %206 = arith.subf %205, %198 : vector<8x32xf32>
    %207 = arith.mulf %206, %204 : vector<8x32xf32>
    %208 = arith.mulf %198, %181 : vector<8x32xf32>
    %209 = arith.addf %207, %208 : vector<8x32xf32>
    %cst_35 = arith.constant dense<0.000000e+00> : vector<8x96xf32>
    %210 = tpu.matmul %209, %2, %cst_35 {dimension_numbers = #tpu.dot_dimension_numbers<[1], [0], [0], [1], [0, 0, 1, 1], [], []>} : vector<8x32xf32>, vector<32x96xf32>, vector<8x96xf32> -> vector<8x96xf32>
    %211 = vector.extract_strided_slice %7 {offsets = [56, 0], sizes = [8, 32], strides = [1, 1]} : vector<64x32xf32> to vector<8x32xf32>
    %212 = vector.extract_strided_slice %210 {offsets = [0, 0], sizes = [8, 32], strides = [1, 1]} : vector<8x96xf32> to vector<8x32xf32>
    %213 = arith.addf %211, %212 : vector<8x32xf32>
    %214 = arith.negf %213 : vector<8x32xf32>
    %215 = math.exp %214 : vector<8x32xf32>
    %cst_36 = arith.constant 1.000000e+00 : f32
    %216 = vector.broadcast %cst_36 : f32 to vector<8x32xf32>
    %217 = arith.addf %216, %215 : vector<8x32xf32>
    %218 = arith.divf %216, %217 : vector<8x32xf32>
    %219 = vector.extract_strided_slice %8 {offsets = [56, 0], sizes = [8, 32], strides = [1, 1]} : vector<64x32xf32> to vector<8x32xf32>
    %220 = vector.extract_strided_slice %210 {offsets = [0, 32], sizes = [8, 32], strides = [1, 1]} : vector<8x96xf32> to vector<8x32xf32>
    %221 = arith.addf %219, %220 : vector<8x32xf32>
    %222 = arith.negf %221 : vector<8x32xf32>
    %223 = math.exp %222 : vector<8x32xf32>
    %cst_37 = arith.constant 1.000000e+00 : f32
    %224 = vector.broadcast %cst_37 : f32 to vector<8x32xf32>
    %225 = arith.addf %224, %223 : vector<8x32xf32>
    %226 = arith.divf %224, %225 : vector<8x32xf32>
    %227 = vector.extract_strided_slice %9 {offsets = [56, 0], sizes = [8, 32], strides = [1, 1]} : vector<64x32xf32> to vector<8x32xf32>
    %228 = vector.extract_strided_slice %210 {offsets = [0, 64], sizes = [8, 32], strides = [1, 1]} : vector<8x96xf32> to vector<8x32xf32>
    %229 = arith.addf %228, %12 : vector<8x32xf32>
    %230 = arith.mulf %218, %229 : vector<8x32xf32>
    %231 = arith.addf %227, %230 : vector<8x32xf32>
    %232 = math.tanh %231 : vector<8x32xf32>
    %cst_38 = arith.constant 1.000000e+00 : f32
    %233 = vector.broadcast %cst_38 : f32 to vector<8x32xf32>
    %234 = arith.subf %233, %226 : vector<8x32xf32>
    %235 = arith.mulf %234, %232 : vector<8x32xf32>
    %236 = arith.mulf %226, %209 : vector<8x32xf32>
    %237 = arith.addf %235, %236 : vector<8x32xf32>
    %c0_39 = arith.constant 0 : index
    %c0_40 = arith.constant 0 : index
    %238 = vector.load %arg3[%c0_39, %c0_40] : memref<33x4xf32, #tpu.memory_space<vmem>>, vector<32x4xf32>
    %cst_41 = arith.constant dense<0.000000e+00> : vector<8x4xf32>
    %239 = tpu.matmul %237, %238, %cst_41 {dimension_numbers = #tpu.dot_dimension_numbers<[1], [0], [0], [1], [0, 0, 1, 1], [], []>} : vector<8x32xf32>, vector<32x4xf32>, vector<8x4xf32> -> vector<8x4xf32>
    %c32 = arith.constant 32 : index
    %c0_42 = arith.constant 0 : index
    %240 = vector.load %arg3[%c32, %c0_42] : memref<33x4xf32, #tpu.memory_space<vmem>>, vector<1x4xf32>
    %241 = vector.broadcast %240 : vector<1x4xf32> to vector<8x4xf32>
    %242 = arith.addf %239, %241 : vector<8x4xf32>
    %cst_43 = arith.constant 0.000000e+00 : f32
    %243 = vector.broadcast %cst_43 : f32 to vector<8x92xf32>
    %244 = tpu.concatenate %237, %242, %243 in 1 : vector<8x32xf32>, vector<8x4xf32>, vector<8x92xf32> -> vector<8x128xf32>
    %c0_44 = arith.constant 0 : index
    %c0_45 = arith.constant 0 : index
    %245 = vector.load %arg4[%c0_44, %c0_45] : memref<8x128xf32, #tpu.memory_space<vmem>>, vector<8x128xf32>
    tpu.vector_store %arg4[%c0_44, %c0_45], %244 {strides = array<i32>} : memref<8x128xf32, #tpu.memory_space<vmem>>, vector<8x128xf32>,
    return
  }
}

</mosaic_0001>

<bundles_post_ra>
// kernel: tpu_custom_call.1
= control target key start
LH: loop header
LB: loop body
LE: loop exit
PB: predicated region body
PF: predicated region fallthrough
CT: control target
= control target key end

     0   :  { %vm36_vm0 = vcmask 64512   ;;  %v1420_v3 = vmov 0.0|0.0   ;;  %s1662_s0 = inlined_call_operand.vmem [shape: f32[64,8], index: 0, kind: input, shape index: {}]   ;;  %s1663_s1 = inlined_call_operand.vmem [shape: f32[40,96], index: 1, kind: input, shape index: {}]   ;;  %s1664_s2 = inlined_call_operand.vmem [shape: f32[2,96], index: 2, kind: input, shape index: {}]   ;;  %s1665_s3 = inlined_call_operand.vmem [shape: f32[33,4], index: 3, kind: input, shape index: {}]   ;;  %s1666_s4 = inlined_call_operand.hbm [shape: f32[8,128], index: 4, kind: output, shape index: {}]  }
   0x1   :  { %v27_v0 = vld [vmem:[%s1663_s1 + $0x8] sm:$0xff]  ;;  %v28_v1 = vld [vmem:[%s1663_s1 + $0x10] sm:$0xff]  ;;  %v26_v2 = vld [vmem:[%s1663_s1] sm:$0xff]  ;;  %1287 = vmatprep.subr.bf16.mxu1 %v1420_v3 }
   0x2   :  { %v1462_v4 = vpack.c.bf16 %v28_v1, %v27_v0  ;;  %1174 = vmatprep.subr.mxu0 %v26_v2  ;;  %v18_v5 = vld [vmem:[%s1662_s0] sm:$0xff]  ;;  %v19_v6 = vld [vmem:[%s1662_s0 + $0x8] sm:$0xff]  ;;  %v29_v7 = vld [vmem:[%s1663_s1 + $0x18] sm:$0xff] }
   0x3   :  { %1175 = vmatpush3.msra.mxu0 %v26_v2  ;;  %1176 = vmatprep.mubr.msk.f32.mxu0 %vm36_vm0, %v18_v5  ;;  %v30_v8 = vld [vmem:[%s1663_s1 + $0x20] sm:$0xff] }
   0x4   :  { %9 = vsyncpa [#allocation3], 0  ;;  %1289 = vmatpush3.bf16.msra.mxu1 %v1462_v4  ;;  %1177 = vmatmul.mubr.msk.f32.vlgmr.msra.gmra.mrb[0].mxu0 %vm36_vm0, %v19_v6  ;;  %v1479_v9 = vpack.c.bf16 %v30_v8, %v29_v7  ;;  %vm1421_vm1 = vmmov 0   ;;  %v1422_v10 = vmov 0.0   ;;  %v1501_v13 = vld [vmem:[%s1664_s2 + $0x1] ss:$0 sm:$0xff] }
   0x5   :  { %1290 = vmatprep.subr.bf16.mxu1 %v1420_v3  ;;  %1196 = vmatprep.mubr.msk.f32.mxu1 %vm1421_vm1, %v1422_v10  ;;  %s1423_s30 = smov 64   ;;  %v1508_v17 = vld [vmem:[%s1664_s2] ss:$0 sm:$0xff]  ;;  %s1424_s7 = smov 96   ;;  %vm171_vm2 = vcmask 261120   ;;  %v20_v48 = vld [vmem:[%s1662_s0 + $0x10] sm:$0xff] }
   0x6   :  { %1299 = vmatprep.subr.bf16.mxu0 %v1420_v3  ;;  %v21_v49 = vld [vmem:[%s1662_s0 + $0x18] sm:$0xff]  ;;  %v22_v50 = vld [vmem:[%s1662_s0 + $0x20] sm:$0xff]  ;;  %1179 = vmatprep.mubr.msk.f32.mxu0 %vm36_vm0, %v20_v48  ;;  %v23_v51 = vld [vmem:[%s1662_s0 + $0x28] sm:$0xff]  ;;  %s1425_s28 = smov 32   ;;  %s1426_s1 = smov [#allocation2]   ;;  %vm1076_vm3 = vcmask 293888  }
   0x7   :  { %1301 = vmatpush3.bf16.msra.mxu0 %v1462_v4  ;;  %v24_v52 = vld [vmem:[%s1662_s0 + $0x30] sm:$0xff]  ;;  %v25_v53 = vld [vmem:[%s1662_s0 + $0x38] sm:$0xff]  ;;  %s1085_s29 = sshll.u32 %s1426_s1, 4  ;;  %s1086_s29 = int_to_ptr.vmem [resolvable:$true] %s1085_s29 }
   0x8   :  { %1292 = vmatpush3.bf16.msra.mxu1 %v1479_v9  ;;  %1302 = vmatprep.subr.bf16.mxu0 %v1420_v3  ;;  %p1401_p1 = scmp.lt.s32.totalorder %s1086_s29, %s1086_s29 }
   0x9   :  { %1293 = vmatprep.subr.bf16.mxu1 %v1420_v3  ;;  %1180 = vmatmul.mubr.msk.f32.gmra.mrb[2].mxu0 %vm36_vm0, %v21_v49 }
   0xa   :  { %1182 = vmatprep.mubr.msk.f32.mxu0 %vm36_vm0, %v22_v50 }
   0xb   :  { %1197 = vmatmul.mubr.f32.vlgmr.msra.gmra.mrb[0].mxu1 %v1422_v10  ;;  %1304 = vmatpush3.bf16.msra.mxu0 %v1479_v9 }
   0xc   :  { %1295 = vmatpush3.bf16.msra.mxu1 %v1462_v4  ;;  %1207 = vmatprep.mubr.msk.f32.mxu1 %vm1421_vm1, %v1422_v10 }
   0xd   :  { %1296 = vmatprep.subr.bf16.mxu1 %v1420_v3  ;;  %1311 = vmatprep.subr.bf16.mxu0 %v1420_v3 }
   0xe   :  { %1183 = vmatmul.mubr.msk.f32.gmra.mrb[4].mxu0 %vm36_vm0, %v23_v51 }
   0xf   :  { %1185 = vmatprep.mubr.msk.f32.mxu0 %vm36_vm0, %v24_v52 }
  0x10   :  { %1298 = vmatpush3.bf16.msra.mxu1 %v1479_v9 }
  0x11   :  { %1305 = vmatprep.subr.bf16.mxu1 %v1420_v3 }
  0x12   :  { %1186 = vmatmul.mubr.msk.f32.gmra.mrb[6].mxu0 %vm36_vm0, %v25_v53 }
  0x13   :  { %1218 = vmatprep.mubr.msk.f32.mxu0 %vm1421_vm1, %v1422_v10 }
  0xd7   :  { %v1178_v11 = vpop.f32.mrb[0].mxu0 }
  0xd8   :  { %v127_v12 = vpop.f32.mrb[1].mxu0  ;;  %v133_v38 = vadd.f32 %v1178_v11, %v1508_v17 }
  0xd9   :  { %v128_v18 = vadd.f32 %v1508_v17, %v127_v12 }
  0xdc   :  { %v1181_v60 = vpop.f32.mrb[2].mxu0 }
  0xdd   :  { %v137_v61 = vpop.f32.mrb[3].mxu0 }
  0xde   :  { %v241_v14 = vpop.f32.mrb[0].mxu1  ;;  %v138_v8 = vadd.f32 %v1508_v17, %v137_v61 }
  0xdf   :  { %v1198_v15 = vpop.f32.mrb[1].mxu1  ;;  %v252_v16 = vadd.f32 %v1501_v13, %v241_v14  ;;  %v245_v19 = vadd.f32 %v241_v14, %v128_v18 }
  0xe1   :  { %254 = vrot.lane.b32.xlu0 %v252_v16, %s1423_s30  ;;  %v1103_v20 = vmul.f32 -1.442695, %v245_v19  ;;  %v1553_v62 = vpop.f32.mrb[4].mxu0 }
  0xe2   :  { %v1555_v63 = vpop.f32.mrb[5].mxu0 }
  0xe3   :  { %1348 = vpow2.f32 %v1103_v20  ;;  %v148_v52 = vadd.f32 %v1508_v17, %v1555_v63 }
  0xe5   :  { %v1557_v0 = vpop.f32.mrb[6].mxu0 }
  0xe6   :  { %v1559_v1 = vpop.f32.mrb[7].mxu0 }
  0xed   :  { %v1349_v21 = vpop.eup %1348 }
  0xee   :  { %v249_v22 = vadd.f32 1.0, %v1349_v21 }
  0xf0   :  { %1350 = vrcp.f32 %v249_v22 }
  0xfa   :  { %v1351_v23 = vpop.eup %1350 }
  0xfb   :  { %v264_v29 = vsub.f32 1.0, %v1351_v23  ;;  %v270_v31 = vmul.f32 0.0, %v1351_v23 }
 0x153   :  { %v255_v24 = vpop.permute.xlu0 %254 }
 0x154   :  { %v257_v25 = vmul.f32 %v1351_v23, %v255_v24 }
 0x156   :  { %259 = vrot.lane.b32.xlu0 %v257_v25, %s1423_s30 }
 0x1c8   :  { %v260_v26 = vpop.permute.xlu0 %259 }
 0x1c9   :  { %v262_v27 = vadd.f32 %v260_v26, %v128_v18 }
 0x1cb   :  { %1352 = vtanh.f32 %v262_v27 }
 0x1d5   :  { %v1353_v28 = vpop.eup %1352 }
 0x1d6   :  { %266 = vrot.lane.b32.xlu1 %v1353_v28, %s1424_s7 }
 0x248   :  { %v267_v30 = vpop.permute.xlu1 %266 }
 0x249   :  { %v269_v32 = vmul.f32 %v267_v30, %v264_v29 }
 0x24b   :  { %v271_v33 = vadd.f32 %v270_v31, %v269_v32  ;;  %v143_v32 = vadd.f32 %v1181_v60, %v1508_v17 }
 0x24d   :  { %273 = vrot.lane.b32.xlu1 %v271_v33, %s1424_s7 }
 0x2bf   :  { %v274_v34 = vpop.permute.xlu1 %273 }
 0x2c0   :  { %1208 = vmatmul.mubr.msk.f32.vlgmr.msra.gmra.mrb[2].mxu1 %vm171_vm2, %v274_v34 }
 0x2c1   :  { %1307 = vmatpush3.bf16.msra.mxu1 %v1462_v4  ;;  %1229 = vmatprep.mubr.msk.f32.mxu1 %vm1421_vm1, %v1422_v10 }
 0x2c2   :  { %1308 = vmatprep.subr.bf16.mxu1 %v1420_v3 }
 0x2c5   :  { %1310 = vmatpush3.bf16.msra.mxu1 %v1479_v9 }
 0x2c6   :  { %1317 = vmatprep.subr.bf16.mxu1 %v1420_v3 }
 0x393   :  { %v343_v35 = vpop.f32.mrb[2].mxu1 }
 0x394   :  { %v354_v36 = vadd.f32 %v1501_v13, %v343_v35  ;;  %v1209_v37 = vpop.f32.mrb[3].mxu1  ;;  %v347_v39 = vadd.f32 %v343_v35, %v133_v38 }
 0x396   :  { %356 = vrot.lane.b32.xlu0 %v354_v36, %s1423_s30  ;;  %v1105_v40 = vmul.f32 -1.442695, %v347_v39 }
 0x398   :  { %1354 = vpow2.f32 %v1105_v40 }
 0x3a2   :  { %v1355_v41 = vpop.eup %1354 }
 0x3a3   :  { %v351_v42 = vadd.f32 1.0, %v1355_v41 }
 0x3a5   :  { %1356 = vrcp.f32 %v351_v42 }
 0x3af   :  { %v1357_v43 = vpop.eup %1356 }
 0x3b0   :  { %v366_v55 = vsub.f32 1.0, %v1357_v43  ;;  %v372_v57 = vmul.f32 %v1357_v43, %v271_v33 }
 0x408   :  { %v357_v44 = vpop.permute.xlu0 %356 }
 0x409   :  { %v359_v45 = vmul.f32 %v1357_v43, %v357_v44 }
 0x40b   :  { %361 = vrot.lane.b32.xlu1 %v359_v45, %s1423_s30 }
 0x47d   :  { %v362_v46 = vpop.permute.xlu1 %361 }
 0x47e   :  { %v364_v47 = vadd.f32 %v362_v46, %v133_v38 }
 0x480   :  { %1358 = vtanh.f32 %v364_v47 }
 0x48a   :  { %v1359_v54 = vpop.eup %1358 }
 0x48b   :  { %368 = vrot.lane.b32.xlu0 %v1359_v54, %s1424_s7 }
 0x4fd   :  { %v369_v56 = vpop.permute.xlu0 %368 }
 0x4fe   :  { %v371_v58 = vmul.f32 %v369_v56, %v366_v55 }
 0x500   :  { %v373_v59 = vadd.f32 %v372_v57, %v371_v58 }
 0x502   :  { %375 = vrot.lane.b32.xlu1 %v373_v59, %s1424_s7 }
 0x574   :  { %v376_v2 = vpop.permute.xlu1 %375 }
 0x575   :  { %1219 = vmatmul.mubr.msk.f32.vlgmr.msra.gmra.mrb[8].mxu0 %vm171_vm2, %v376_v2 }
 0x576   :  { %1313 = vmatpush3.bf16.msra.mxu0 %v1462_v4  ;;  %1240 = vmatprep.mubr.msk.f32.mxu0 %vm1421_vm1, %v1422_v10 }
 0x577   :  { %1314 = vmatprep.subr.bf16.mxu0 %v1420_v3 }
 0x57a   :  { %1316 = vmatpush3.bf16.msra.mxu0 %v1479_v9 }
 0x57b   :  { %1323 = vmatprep.subr.bf16.mxu0 %v1420_v3 }
 0x648   :  { %v445_v5 = vpop.f32.mrb[8].mxu0 }
 0x649   :  { %v456_v6 = vadd.f32 %v1501_v13, %v445_v5  ;;  %v1220_v7 = vpop.f32.mrb[9].mxu0  ;;  %v449_v11 = vadd.f32 %v445_v5, %v138_v8 }
 0x64b   :  { %458 = vrot.lane.b32.xlu0 %v456_v6, %s1423_s30  ;;  %v1107_v12 = vmul.f32 -1.442695, %v449_v11 }
 0x64d   :  { %1360 = vpow2.f32 %v1107_v12 }
 0x657   :  { %v1361_v14 = vpop.eup %1360 }
 0x658   :  { %v453_v15 = vadd.f32 1.0, %v1361_v14 }
 0x65a   :  { %1362 = vrcp.f32 %v453_v15 }
 0x664   :  { %v1363_v16 = vpop.eup %1362 }
 0x665   :  { %v468_v23 = vsub.f32 1.0, %v1363_v16  ;;  %v474_v25 = vmul.f32 %v1363_v16, %v373_v59 }
 0x6bd   :  { %v459_v18 = vpop.permute.xlu0 %458 }
 0x6be   :  { %v461_v19 = vmul.f32 %v1363_v16, %v459_v18  ;;  %v153_v16 = vadd.f32 %v1553_v62, %v1508_v17 }
 0x6c0   :  { %463 = vrot.lane.b32.xlu1 %v461_v19, %s1423_s30 }
 0x732   :  { %v464_v20 = vpop.permute.xlu1 %463 }
 0x733   :  { %v466_v21 = vadd.f32 %v464_v20, %v138_v8 }
 0x735   :  { %1364 = vtanh.f32 %v466_v21 }
 0x73f   :  { %v1365_v22 = vpop.eup %1364 }
 0x740   :  { %470 = vrot.lane.b32.xlu0 %v1365_v22, %s1424_s7 }
 0x7b2   :  { %v471_v24 = vpop.permute.xlu0 %470 }
 0x7b3   :  { %v473_v26 = vmul.f32 %v471_v24, %v468_v23 }
 0x7b5   :  { %v475_v27 = vadd.f32 %v474_v25, %v473_v26 }
 0x7b7   :  { %477 = vrot.lane.b32.xlu1 %v475_v27, %s1424_s7 }
 0x829   :  { %v478_v28 = vpop.permute.xlu1 %477 }
 0x82a   :  { %1230 = vmatmul.mubr.msk.f32.vlgmr.msra.gmra.mrb[4].mxu1 %vm171_vm2, %v478_v28 }
 0x82b   :  { %1319 = vmatpush3.bf16.msra.mxu1 %v1462_v4  ;;  %1251 = vmatprep.mubr.msk.f32.mxu1 %vm1421_vm1, %v1422_v10 }
 0x82c   :  { %1320 = vmatprep.subr.bf16.mxu1 %v1420_v3 }
 0x82f   :  { %1322 = vmatpush3.bf16.msra.mxu1 %v1479_v9 }
 0x830   :  { %1329 = vmatprep.subr.bf16.mxu1 %v1420_v3 }
 0x8fd   :  { %v547_v29 = vpop.f32.mrb[4].mxu1 }
 0x8fe   :  { %v558_v30 = vadd.f32 %v1501_v13, %v547_v29  ;;  %v1231_v31 = vpop.f32.mrb[5].mxu1  ;;  %v551_v33 = vadd.f32 %v547_v29, %v143_v32 }
 0x900   :  { %560 = vrot.lane.b32.xlu0 %v558_v30, %s1423_s30  ;;  %v1109_v34 = vmul.f32 -1.442695, %v551_v33 }
 0x902   :  { %1366 = vpow2.f32 %v1109_v34  ;;  %v158_v34 = vadd.f32 %v1508_v17, %v1559_v1 }
 0x90c   :  { %v1367_v35 = vpop.eup %1366 }
 0x90d   :  { %v555_v36 = vadd.f32 1.0, %v1367_v35 }
 0x90f   :  { %1368 = vrcp.f32 %v555_v36 }
 0x919   :  { %v1369_v37 = vpop.eup %1368 }
 0x91a   :  { %v570_v43 = vsub.f32 1.0, %v1369_v37  ;;  %v576_v45 = vmul.f32 %v1369_v37, %v475_v27 }
 0x972   :  { %v561_v38 = vpop.permute.xlu0 %560 }
 0x973   :  { %v563_v39 = vmul.f32 %v1369_v37, %v561_v38 }
 0x975   :  { %565 = vrot.lane.b32.xlu1 %v563_v39, %s1423_s30 }
 0x9e7   :  { %v566_v40 = vpop.permute.xlu1 %565 }
 0x9e8   :  { %v568_v41 = vadd.f32 %v566_v40, %v143_v32 }
 0x9ea   :  { %1370 = vtanh.f32 %v568_v41 }
 0x9f4   :  { %v1371_v42 = vpop.eup %1370 }
 0x9f5   :  { %572 = vrot.lane.b32.xlu0 %v1371_v42, %s1424_s7 }
 0xa67   :  { %v573_v44 = vpop.permute.xlu0 %572 }
 0xa68   :  { %v575_v46 = vmul.f32 %v573_v44, %v570_v43 }
 0xa6a   :  { %v577_v47 = vadd.f32 %v576_v45, %v575_v46 }
 0xa6c   :  { %579 = vrot.lane.b32.xlu1 %v577_v47, %s1424_s7 }
 0xade   :  { %v580_v48 = vpop.permute.xlu1 %579 }
 0xadf   :  { %1241 = vmatmul.mubr.msk.f32.vlgmr.msra.gmra.mrb[10].mxu0 %vm171_vm2, %v580_v48 }
 0xae0   :  { %1325 = vmatpush3.bf16.msra.mxu0 %v1462_v4  ;;  %1262 = vmatprep.mubr.msk.f32.mxu0 %vm1421_vm1, %v1422_v10 }
 0xae1   :  { %1326 = vmatprep.subr.bf16.mxu0 %v1420_v3 }
 0xae4   :  { %1328 = vmatpush3.bf16.msra.mxu0 %v1479_v9 }
 0xae5   :  { %1335 = vmatprep.subr.bf16.mxu0 %v1420_v3 }
 0xbb2   :  { %v649_v49 = vpop.f32.mrb[10].mxu0 }
 0xbb3   :  { %v660_v50 = vadd.f32 %v1501_v13, %v649_v49  ;;  %v1242_v51 = vpop.f32.mrb[11].mxu0  ;;  %v653_v53 = vadd.f32 %v649_v49, %v148_v52 }
 0xbb5   :  { %662 = vrot.lane.b32.xlu0 %v660_v50, %s1423_s30  ;;  %v1111_v54 = vmul.f32 -1.442695, %v653_v53 }
 0xbb7   :  { %1372 = vpow2.f32 %v1111_v54 }
 0xbc1   :  { %v1373_v55 = vpop.eup %1372 }
 0xbc2   :  { %v657_v56 = vadd.f32 1.0, %v1373_v55 }
 0xbc4   :  { %1374 = vrcp.f32 %v657_v56 }
 0xbce   :  { %v1375_v57 = vpop.eup %1374 }
 0xbcf   :  { %v672_v5 = vsub.f32 1.0, %v1375_v57  ;;  %v678_v63 = vmul.f32 %v1375_v57, %v577_v47 }
 0xc27   :  { %v663_v58 = vpop.permute.xlu0 %662 }
 0xc28   :  { %v665_v59 = vmul.f32 %v1375_v57, %v663_v58 }
 0xc2a   :  { %667 = vrot.lane.b32.xlu1 %v665_v59, %s1423_s30 }
 0xc9c   :  { %v668_v60 = vpop.permute.xlu1 %667 }
 0xc9d   :  { %v670_v61 = vadd.f32 %v668_v60, %v148_v52  ;;  %v163_v52 = vadd.f32 %v1557_v0, %v1508_v17  ;;  %v987_v17 = vld [vmem:[%s1665_s3 + $0x8] sm:$0xff]  ;;  %v988_v0 = vld [vmem:[%s1665_s3 + $0x10] sm:$0xff] }
 0xc9f   :  { %1376 = vtanh.f32 %v670_v61 }
 0xca9   :  { %v1377_v2 = vpop.eup %1376 }
 0xcaa   :  { %674 = vrot.lane.b32.xlu0 %v1377_v2, %s1424_s7 }
 0xd1c   :  { %v675_v6 = vpop.permute.xlu0 %674 }
 0xd1d   :  { %v677_v7 = vmul.f32 %v675_v6, %v672_v5  ;;  %v989_v5 = vld [vmem:[%s1665_s3 + $0x18] sm:$0xff] }
 0xd1e   :  { %v1339_v6 = vpack.c.bf16 %v989_v5, %v988_v0 }
 0xd1f   :  { %v679_v8 = vadd.f32 %v678_v63, %v677_v7 }
 0xd21   :  { %681 = vrot.lane.b32.xlu1 %v679_v8, %s1424_s7 }
 0xd93   :  { %v682_v11 = vpop.permute.xlu1 %681 }
 0xd94   :  { %1252 = vmatmul.mubr.msk.f32.vlgmr.msra.gmra.mrb[6].mxu1 %vm171_vm2, %v682_v11 }
 0xd95   :  { %1331 = vmatpush3.bf16.msra.mxu1 %v1462_v4  ;;  %1273 = vmatprep.mubr.msk.f32.mxu1 %vm1421_vm1, %v1422_v10 }
 0xd96   :  { %1332 = vmatprep.subr.bf16.mxu1 %v1420_v3 }
 0xd99   :  { %1334 = vmatpush3.bf16.msra.mxu1 %v1479_v9 }
 0xe67   :  { %v751_v12 = vpop.f32.mrb[6].mxu1 }
 0xe68   :  { %v762_v14 = vadd.f32 %v1501_v13, %v751_v12  ;;  %v1253_v15 = vpop.f32.mrb[7].mxu1  ;;  %v755_v18 = vadd.f32 %v751_v12, %v153_v16 }
 0xe6a   :  { %764 = vrot.lane.b32.xlu0 %v762_v14, %s1423_s30  ;;  %v1113_v19 = vmul.f32 -1.442695, %v755_v18 }
 0xe6c   :  { %1378 = vpow2.f32 %v1113_v19 }
 0xe76   :  { %v1379_v4 = vpop.eup %1378 }
 0xe77   :  { %v759_v20 = vadd.f32 1.0, %v1379_v4 }
 0xe79   :  { %1380 = vrcp.f32 %v759_v20 }
 0xe83   :  { %v1381_v21 = vpop.eup %1380 }
 0xe84   :  { %v774_v26 = vsub.f32 1.0, %v1381_v21  ;;  %v780_v62 = vmul.f32 %v1381_v21, %v679_v8 }
 0xedc   :  { %v765_v22 = vpop.permute.xlu0 %764 }
 0xedd   :  { %v767_v23 = vmul.f32 %v1381_v21, %v765_v22 }
 0xedf   :  { %769 = vrot.lane.b32.xlu1 %v767_v23, %s1423_s30 }
 0xf51   :  { %v770_v9 = vpop.permute.xlu1 %769 }
 0xf52   :  { %v772_v24 = vadd.f32 %v770_v9, %v153_v16  ;;  %v1118_v16 = vld [vmem:[%s1665_s3 + $0x20] ss:$0 sm:$0xff] }
 0xf54   :  { %1382 = vtanh.f32 %v772_v24 }
 0xf5e   :  { %v1383_v25 = vpop.eup %1382 }
 0xf5f   :  { %776 = vrot.lane.b32.xlu0 %v1383_v25, %s1424_s7 }
 0xfd1   :  { %v777_v27 = vpop.permute.xlu0 %776 }
 0xfd2   :  { %v779_v28 = vmul.f32 %v777_v27, %v774_v26 }
 0xfd4   :  { %v781_v29 = vadd.f32 %v780_v62, %v779_v28 }
 0xfd6   :  { %783 = vrot.lane.b32.xlu1 %v781_v29, %s1424_s7 }
0x1048   :  { %v784_v30 = vpop.permute.xlu1 %783 }
0x1049   :  { %1263 = vmatmul.mubr.msk.f32.vlgmr.msra.gmra.mrb[12].mxu0 %vm171_vm2, %v784_v30 }
0x104a   :  { %1284 = vmatprep.mubr.msk.f32.mxu0 %vm1421_vm1, %v1422_v10 }
0x111c   :  { %v853_v31 = vpop.f32.mrb[12].mxu0 }
0x111d   :  { %v864_v32 = vadd.f32 %v1501_v13, %v853_v31  ;;  %v1264_v33 = vpop.f32.mrb[13].mxu0  ;;  %v857_v35 = vadd.f32 %v853_v31, %v158_v34 }
0x111f   :  { %866 = vrot.lane.b32.xlu0 %v864_v32, %s1423_s30  ;;  %v1115_v36 = vmul.f32 -1.442695, %v857_v35 }
0x1121   :  { %1384 = vpow2.f32 %v1115_v36 }
0x112b   :  { %v1385_v37 = vpop.eup %1384 }
0x112c   :  { %v861_v38 = vadd.f32 1.0, %v1385_v37 }
0x112e   :  { %1386 = vrcp.f32 %v861_v38 }
0x1138   :  { %v1387_v39 = vpop.eup %1386 }
0x1139   :  { %v876_v44 = vsub.f32 1.0, %v1387_v39  ;;  %v882_v1 = vmul.f32 %v1387_v39, %v781_v29 }
0x1191   :  { %v867_v40 = vpop.permute.xlu0 %866 }
0x1192   :  { %v869_v41 = vmul.f32 %v1387_v39, %v867_v40 }
0x1194   :  { %871 = vrot.lane.b32.xlu1 %v869_v41, %s1423_s30 }
0x1206   :  { %v872_v10 = vpop.permute.xlu1 %871 }
0x1207   :  { %v874_v42 = vadd.f32 %v872_v10, %v158_v34 }
0x1209   :  { %1388 = vtanh.f32 %v874_v42 }
0x1213   :  { %v1389_v43 = vpop.eup %1388 }
0x1214   :  { %878 = vrot.lane.b32.xlu0 %v1389_v43, %s1424_s7 }
0x1286   :  { %v879_v45 = vpop.permute.xlu0 %878 }
0x1287   :  { %v881_v46 = vmul.f32 %v879_v45, %v876_v44 }
0x1289   :  { %v883_v47 = vadd.f32 %v882_v1, %v881_v46 }
0x128b   :  { %885 = vrot.lane.b32.xlu1 %v883_v47, %s1424_s7 }
0x12fd   :  { %v886_v48 = vpop.permute.xlu1 %885 }
0x12fe   :  { %1274 = vmatmul.mubr.msk.f32.vlgmr.msra.gmra.mrb[8].mxu1 %vm171_vm2, %v886_v48 }
0x13d1   :  { %v955_v49 = vpop.f32.mrb[8].mxu1 }
0x13d2   :  { %v966_v50 = vadd.f32 %v1501_v13, %v955_v49  ;;  %v1275_v51 = vpop.f32.mrb[9].mxu1  ;;  %v959_v53 = vadd.f32 %v955_v49, %v163_v52  ;;  %v986_v13 = vld [vmem:[%s1665_s3] sm:$0xff] }
0x13d3   :  { %v1336_v2 = vpack.c.bf16 %v987_v17, %v986_v13 }
0x13d4   :  { %968 = vrot.lane.b32.xlu0 %v966_v50, %s1423_s30  ;;  %v1117_v54 = vmul.f32 -1.442695, %v959_v53 }
0x13d5   :  { %1337 = vmatpush3.bf16.msra.mxu0 %v1336_v2 }
0x13d6   :  { %1390 = vpow2.f32 %v1117_v54  ;;  %1338 = vmatprep.subr.bf16.mxu0 %v1420_v3 }
0x13d9   :  { %1340 = vmatpush3.bf16.msra.mxu0 %v1339_v6 }
0x13e0   :  { %v1391_v55 = vpop.eup %1390 }
0x13e1   :  { %v963_v56 = vadd.f32 1.0, %v1391_v55 }
0x13e3   :  { %1392 = vrcp.f32 %v963_v56 }
0x13ed   :  { %v1393_v57 = vpop.eup %1392 }
0x13ee   :  { %v978_v7 = vsub.f32 1.0, %v1393_v57  ;;  %v984_v11 = vmul.f32 %v1393_v57, %v883_v47 }
0x1446   :  { %v969_v58 = vpop.permute.xlu0 %968 }
0x1447   :  { %v971_v59 = vmul.f32 %v1393_v57, %v969_v58 }
0x1449   :  { %973 = vrot.lane.b32.xlu1 %v971_v59, %s1423_s30  ;;  %s1396_s30 = scalar_lea.vmem %s1086_s29, 128 }
0x144a   :  { %p1397_p0 = scmp.ne.s32.totalorder %s1086_s29, %s1396_s30  ;;  %p1402_p2 = scmp.lt.s32.totalorder %s1396_s30, %s1396_s30 }
0x144c   :  { %p1403_p3 = por %p1402_p2, %p1401_p1 }
0x144e   :  { %p1404_p4 = pnand %p1403_p3, %p1397_p0 }
0x14bb   :  { %v974_v60 = vpop.permute.xlu1 %973 }
0x14bc   :  { %v976_v61 = vadd.f32 %v974_v60, %v163_v52 }
0x14be   :  { %1394 = vtanh.f32 %v976_v61 }
0x14c8   :  { %v1395_v63 = vpop.eup %1394 }
0x14c9   :  { %980 = vrot.lane.b32.xlu0 %v1395_v63, %s1424_s7 }
0x153b   :  { %v981_v8 = vpop.permute.xlu0 %980 }
0x153c   :  { %v983_v12 = vmul.f32 %v981_v8, %v978_v7 }
0x153e   :  { %v985_v14 = vadd.f32 %v984_v11, %v983_v12 }
0x1540   :  { %996 = vrot.lane.b32.xlu1 %v985_v14, %s1424_s7 }
0x15b2   :  { %v997_v15 = vpop.permute.xlu1 %996 }
0x15b3   :  { %1285 = vmatmul.mubr.msk.f32.vlgmr.msra.gmra.mrb[14].mxu0 %vm171_vm2, %v997_v15 }
0x1686   :  { %v1066_v18 = vpop.f32.mrb[14].mxu0 }
0x1687   :  { %v1067_v3 = vadd.f32 %v1118_v16, %v1066_v18  ;;  %v1286_v19 = vpop.f32.mrb[15].mxu0 }
0x1689   :  { %1072 = vrot.lane.b32.xlu0 %v1067_v3, %s1425_s28 }
0x16fb   :  { %v1073_v4 = vpop.permute.xlu0 %1072 }
0x16fc   :  { %v1075_v20 = vsel %vm171_vm2, %v997_v15, %v1073_v4 }
0x16fd   :  { %v1077_v21 = vsel %vm1076_vm3, %v1075_v20, 0.0 }
0x16fe   :  { %1078 = vst [vmem:[#allocation2] sm:$0xff] %v1077_v21 }
0x16ff   :  { %1407 = shalt.err (!%p1404_p4)
}
0x1700   :  { %s1408_s6 = scalar_lea.hbm %s1666_s4, 128 }
0x1701   :  { %p1409_p5 = scmp.ne.s32.totalorder %s1666_s4, %s1408_s6  ;;  %p1412_p6 = scmp.lt.u32.totalorder %s1408_s6, %s1666_s4 }
0x1703   :  { %p1414_p7 = pnand %p1412_p6, %p1409_p5 }
0x1705   :  { %1417 = shalt.err (!%p1414_p7)
}
0x1706   :  { %1088 = dma.vmem_to_hbm [thread:$0]  %s1086_s29, 128, %s1666_s4, [#allocation3]  }
0x1707   :  { %1418 = dma.done.wait [#allocation3], 128  }
0x1708   :  { %1419 = vsyncadd [#allocation3], 4294967168 }
0x1709   :  { %1092 = vsyncpa [#allocation3], 1 }

</bundles_post_ra>
